<compile_context>
chip_gen: v6e
topology: v6e:2x2x1
jax: 0.10.0
libtpu: 0.0.40
codegen_flags: <defaults>
</compile_context>

<pallas_src>
import functools

import jax
import jax.numpy as jnp
from jax.experimental import pallas as pl
from jax.experimental.pallas import tpu as pltpu

LN_EPS = 1e-5  # torch.nn.LayerNorm default


def _round_up(x, m):
    return ((x + m - 1) // m) * m


@functools.lru_cache(maxsize=1)
def _vmem_limits():
    """(tile budget bytes, vmem_limit_bytes) — generation aware."""
    try:
        cap = int(pltpu.get_tpu_info().vmem_capacity_bytes)
    except Exception:  # pragma: no cover - conservative fallback
        cap = 64 * 1024 * 1024
    if cap >= 128 * 1024 * 1024:          # v5e / v6e: 128 MiB physical
        return 56 * 1024 * 1024, 96 * 1024 * 1024
    return 24 * 1024 * 1024, 48 * 1024 * 1024  # v7x (64 MiB/TC) or unknown


def _prenorm_kernel(x_ref, gamma_ref, beta_ref, w_ref, b_ref, o_ref, *, d_true):
    # x: (tm, D_pad)   gamma/beta: (1, D_pad) f32 (zero in padded lanes)
    # w: (D_pad, tn) bf16 (zero in padded rows)   b: (1, tn) f32
    # o: (tm, tn) in the input dtype.
    x = x_ref[...].astype(jnp.float32)

    # LayerNorm over the last axis, sum-based so zero-padded lanes are inert.
    inv_d = jnp.float32(1.0 / d_true)
    s1 = jnp.sum(x, axis=-1, keepdims=True)
    s2 = jnp.sum(x * x, axis=-1, keepdims=True)
    mean = s1 * inv_d
    var = jnp.maximum(s2 * inv_d - mean * mean, 0.0)
    inv = jax.lax.rsqrt(var + LN_EPS)
    # Padded lanes: gamma=beta=0  =>  y == 0 there.
    y = (x - mean) * inv * gamma_ref[...] + beta_ref[...]

    # fn: Linear(dim -> hidden). bf16 MXU inputs, f32 accumulation.
    out = jnp.dot(y.astype(w_ref.dtype), w_ref[...],
                  preferred_element_type=jnp.float32)
    out = out + b_ref[...]

    o_ref[...] = out.astype(o_ref.dtype)


@functools.partial(jax.jit, static_argnames=("tm",))
def prenorm_forward(x, gamma, beta, w, b, *, tm=4096):
    """x: [B, N, D] -> [B, N, H] with H = w.shape[1]."""
    B, N, D = x.shape
    H = w.shape[1]
    M = B * N

    # Lane-dense layouts: pad both D (contraction) and H (output) to 128.
    D_pad = _round_up(D, 128)
    H_pad = _round_up(H, 128)

    out_dtype = x.dtype
    x_it = jnp.dtype(x.dtype).itemsize
    out_it = jnp.dtype(out_dtype).itemsize
    w_mxu_dtype = jnp.bfloat16
    w_it = jnp.dtype(w_mxu_dtype).itemsize

    # Sublane alignment of the row tile (8 f32, 16 bf16, 32 i8).
    row_align = max(8, 32 // x_it)

    budget, vmem_limit = _vmem_limits()

    # --- H tiling (only if the resident weight would be too big: v7x-first) ---
    w_budget = 32 * 1024 * 1024 if budget > 32 * 1024 * 1024 else 12 * 1024 * 1024
    if D_pad * H_pad * w_it > w_budget:
        tn = max(128, ((w_budget // (D_pad * w_it)) // 128) * 128)
    else:
        tn = H_pad
    grid_h = pl.cdiv(H_pad, tn)
    w_bufs = 1 if grid_h == 1 else 2   # single-buffer only if grid-invariant

    # --- row tile sizing: MiB-scale tiles, real itemsizes, VMEM-budgeted -----
    resident = w_bufs * (D_pad * tn * w_it + tn * 4) + 2 * D_pad * 4
    # double-buffered x/out tiles + in-kernel f32/bf16 intermediates per row
    per_row = 2 * (D_pad * x_it + tn * out_it) + (10 * D_pad + 4 * tn)
    tm_cap = max(budget - resident, per_row * row_align) // per_row
    tm_eff = min(tm, tm_cap, _round_up(M, row_align))
    if M > row_align:
        # v7x: two TensorCores split the parallel axis — keep >= 2 grid steps.
        tm_eff = min(tm_eff, _round_up(pl.cdiv(M, 2), row_align))
    tm_eff = max(row_align, (tm_eff // row_align) * row_align)
    grid_m = pl.cdiv(M, tm_eff)   # no wrapper-side row padding; ragged is OK

    # --- wrapper-side layout / dtype prep (hoisted out of the kernel) --------
    x2d = x.reshape(M, D)
    gamma2d = gamma.astype(jnp.float32).reshape(1, D)
    beta2d = beta.astype(jnp.float32).reshape(1, D)
    if D_pad != D:
        x2d = jnp.pad(x2d, ((0, 0), (0, D_pad - D)))
        gamma2d = jnp.pad(gamma2d, ((0, 0), (0, D_pad - D)))   # zeros
        beta2d = jnp.pad(beta2d, ((0, 0), (0, D_pad - D)))     # zeros
    w_p = w.astype(w_mxu_dtype)
    if D_pad != D or H_pad != H:
        w_p = jnp.pad(w_p, ((0, D_pad - D), (0, H_pad - H)))   # zeros
    b_p = b.astype(jnp.float32).reshape(1, H)
    if H_pad != H:
        b_p = jnp.pad(b_p, ((0, 0), (0, H_pad - H)))

    invariant = pl.Buffered(buffer_count=1)
    w_mode = invariant if grid_h == 1 else None

    kernel = functools.partial(_prenorm_kernel, d_true=float(D))

    out2d = pl.pallas_call(
        kernel,
        out_shape=jax.ShapeDtypeStruct((M, H_pad), out_dtype),
        grid_spec=pltpu.PrefetchScalarGridSpec(
            num_scalar_prefetch=0,
            grid=(grid_m, grid_h),
            in_specs=[
                pl.BlockSpec((tm_eff, D_pad), lambda i, j: (i, 0)),     # x rows
                pl.BlockSpec((1, D_pad), lambda i, j: (0, 0),
                             pipeline_mode=invariant),                  # gamma
                pl.BlockSpec((1, D_pad), lambda i, j: (0, 0),
                             pipeline_mode=invariant),                  # beta
                pl.BlockSpec((D_pad, tn), lambda i, j: (0, j),
                             pipeline_mode=w_mode),                     # weight
                pl.BlockSpec((1, tn), lambda i, j: (0, j),
                             pipeline_mode=w_mode),                     # bias
            ],
            out_specs=pl.BlockSpec((tm_eff, tn), lambda i, j: (i, j)),
        ),
        compiler_params=pltpu.CompilerParams(
            dimension_semantics=("parallel", "parallel"),
            vmem_limit_bytes=vmem_limit,
        ),
    )(x2d, gamma2d, beta2d, w_p, b_p)

    if H_pad != H:
        out2d = out2d[:, :H]
    return out2d.reshape(B, N, H)


def reference_forward(x, gamma, beta, w, b):
    xf = x.astype(jnp.float32)
    mean = jnp.mean(xf, axis=-1, keepdims=True)
    var = jnp.mean((xf - mean) ** 2, axis=-1, keepdims=True)
    y = (xf - mean) / jnp.sqrt(var + LN_EPS)
    y = y * gamma + beta
    return (y @ w + b).astype(x.dtype)


if __name__ == "__main__":
    key = jax.random.PRNGKey(0)
    B, N, D, H = 2, 8, 32, 64   # small MobileViT-like token tensor

    kx, kw, kb = jax.random.split(key, 3)
    x = jax.random.normal(kx, (B, N, D), dtype=jnp.float32)

    # LayerNorm params: torch default init (gamma=1, beta=0)
    gamma = jnp.ones((D,), dtype=jnp.float32)
    beta = jnp.zeros((D,), dtype=jnp.float32)

    # fn = Linear(D, H): deterministic init in-script
    w = jax.random.normal(kw, (D, H), dtype=jnp.float32) * (1.0 / jnp.sqrt(D))
    b = jax.random.normal(kb, (H,), dtype=jnp.float32) * 0.01

    out = prenorm_forward(x, gamma, beta, w, b)
    out = jax.block_until_ready(out)

    ref = reference_forward(x, gamma, beta, w, b)
    assert out.shape == (B, N, H), out.shape
    # Tolerance widened because the linear layer feeds the MXU in bf16
    # (f32 accumulation), per the perf review.
    assert jnp.allclose(out, ref, atol=3e-2, rtol=3e-2), \
        float(jnp.max(jnp.abs(out - ref)))

    print("KERNEL_OK")
</pallas_src>

<mosaic_0001>
module attributes {stable_mosaic.version = 11 : i64} {
  func.func @_prenorm_kernel(%arg0: i32, %arg1: i32, %arg2: memref<8x128xf32, #tpu.memory_space<vmem>>, %arg3: memref<1x128xf32, #tpu.memory_space<vmem>>, %arg4: memref<1x128xf32, #tpu.memory_space<vmem>>, %arg5: memref<128x128xbf16, #tpu.memory_space<vmem>>, %arg6: memref<1x128xf32, #tpu.memory_space<vmem>>, %arg7: memref<8x128xf32, #tpu.memory_space<vmem>>) attributes {dimension_semantics = [#tpu.dimension_semantics<parallel>, #tpu.dimension_semantics<parallel>], iteration_bounds = array<i64: 2, 1>, scalar_prefetch = 0 : i64, scratch_operands = 0 : i64, tpu.core_type = #tpu.core_type<tc>, window_params = [{transform_indices = @transform_0, window_bounds = array<i64: 8, 128>}, {pipeline_mode = #tpu.pipeline_mode<synchronous>, transform_indices = @transform_1, window_bounds = array<i64: 1, 128>}, {pipeline_mode = #tpu.pipeline_mode<synchronous>, transform_indices = @transform_2, window_bounds = array<i64: 1, 128>}, {pipeline_mode = #tpu.pipeline_mode<synchronous>, transform_indices = @transform_3, window_bounds = array<i64: 128, 128>}, {pipeline_mode = #tpu.pipeline_mode<synchronous>, transform_indices = @transform_4, window_bounds = array<i64: 1, 128>}, {transform_indices = @transform_5, window_bounds = array<i64: 8, 128>}]} {
    %c0 = arith.constant 0 : index
    %c0_0 = arith.constant 0 : index
    %0 = vector.load %arg2[%c0, %c0_0] : memref<8x128xf32, #tpu.memory_space<vmem>>, vector<8x128xf32>
    %cst = arith.constant dense<0.000000e+00> : vector<8xf32>
    %1 = vector.multi_reduction <add>, %0, %cst [1] : vector<8x128xf32> to vector<8xf32>
    %2 = vector.shape_cast %1 : vector<8xf32> to vector<8x1xf32>
    %3 = arith.mulf %0, %0 : vector<8x128xf32>
    %cst_1 = arith.constant dense<0.000000e+00> : vector<8xf32>
    %4 = vector.multi_reduction <add>, %3, %cst_1 [1] : vector<8x128xf32> to vector<8xf32>
    %5 = vector.shape_cast %4 : vector<8xf32> to vector<8x1xf32>
    %cst_2 = arith.constant 3.125000e-02 : f32
    %6 = vector.broadcast %cst_2 : f32 to vector<8x1xf32>
    %7 = arith.mulf %2, %6 : vector<8x1xf32>
    %cst_3 = arith.constant 3.125000e-02 : f32
    %8 = vector.broadcast %cst_3 : f32 to vector<8x1xf32>
    %9 = arith.mulf %5, %8 : vector<8x1xf32>
    %10 = arith.mulf %7, %7 : vector<8x1xf32>
    %11 = arith.subf %9, %10 : vector<8x1xf32>
    %cst_4 = arith.constant 0.000000e+00 : f32
    %12 = vector.broadcast %cst_4 : f32 to vector<8x1xf32>
    %13 = arith.maximumf %11, %12 : vector<8x1xf32>
    %cst_5 = arith.constant 9.99999974E-6 : f32
    %14 = vector.broadcast %cst_5 : f32 to vector<8x1xf32>
    %15 = arith.addf %13, %14 : vector<8x1xf32>
    %16 = math.rsqrt %15 : vector<8x1xf32>
    %17 = vector.broadcast %7 : vector<8x1xf32> to vector<8x128xf32>
    %18 = arith.subf %0, %17 : vector<8x128xf32>
    %19 = vector.broadcast %16 : vector<8x1xf32> to vector<8x128xf32>
    %20 = arith.mulf %18, %19 : vector<8x128xf32>
    %c0_6 = arith.constant 0 : index
    %c0_7 = arith.constant 0 : index
    %21 = vector.load %arg3[%c0_6, %c0_7] : memref<1x128xf32, #tpu.memory_space<vmem>>, vector<1x128xf32>
    %22 = vector.broadcast %21 : vector<1x128xf32> to vector<8x128xf32>
    %23 = arith.mulf %20, %22 : vector<8x128xf32>
    %c0_8 = arith.constant 0 : index
    %c0_9 = arith.constant 0 : index
    %24 = vector.load %arg4[%c0_8, %c0_9] : memref<1x128xf32, #tpu.memory_space<vmem>>, vector<1x128xf32>
    %25 = vector.broadcast %24 : vector<1x128xf32> to vector<8x128xf32>
    %26 = arith.addf %23, %25 : vector<8x128xf32>
    %27 = arith.truncf %26 : vector<8x128xf32> to vector<8x128xbf16>
    %c0_10 = arith.constant 0 : index
    %c0_11 = arith.constant 0 : index
    %28 = vector.load %arg5[%c0_10, %c0_11] : memref<128x128xbf16, #tpu.memory_space<vmem>>, vector<128x128xbf16>
    %cst_12 = arith.constant dense<0.000000e+00> : vector<8x128xf32>
    %29 = tpu.matmul %27, %28, %cst_12 {dimension_numbers = #tpu.dot_dimension_numbers<[1], [0], [0], [1], [0, 0, 1, 1], [], []>} : vector<8x128xbf16>, vector<128x128xbf16>, vector<8x128xf32> -> vector<8x128xf32>
    %c0_13 = arith.constant 0 : index
    %c0_14 = arith.constant 0 : index
    %30 = vector.load %arg6[%c0_13, %c0_14] : memref<1x128xf32, #tpu.memory_space<vmem>>, vector<1x128xf32>
    %31 = vector.broadcast %30 : vector<1x128xf32> to vector<8x128xf32>
    %32 = arith.addf %29, %31 : vector<8x128xf32>
    %c0_15 = arith.constant 0 : index
    %c0_16 = arith.constant 0 : index
    %33 = vector.load %arg7[%c0_15, %c0_16] : memref<8x128xf32, #tpu.memory_space<vmem>>, vector<8x128xf32>
    tpu.vector_store %arg7[%c0_15, %c0_16], %32 {strides = array<i32>} : memref<8x128xf32, #tpu.memory_space<vmem>>, vector<8x128xf32>,
    return
  }
  func.func @transform_0(%arg0: i32, %arg1: i32) -> (i32, i32) {
    %c0_i32 = arith.constant 0 : i32
    %c0_i32_0 = arith.constant 0 : i32
    return %arg0, %c0_i32 : i32, i32
  }
  func.func @transform_1(%arg0: i32, %arg1: i32) -> (i32, i32) {
    %c0_i32 = arith.constant 0 : i32
    %c0_i32_0 = arith.constant 0 : i32
    %c0_i32_1 = arith.constant 0 : i32
    return %c0_i32, %c0_i32_0 : i32, i32
  }
  func.func @transform_2(%arg0: i32, %arg1: i32) -> (i32, i32) {
    %c0_i32 = arith.constant 0 : i32
    %c0_i32_0 = arith.constant 0 : i32
    %c0_i32_1 = arith.constant 0 : i32
    return %c0_i32, %c0_i32_0 : i32, i32
  }
  func.func @transform_3(%arg0: i32, %arg1: i32) -> (i32, i32) {
    %c0_i32 = arith.constant 0 : i32
    %c0_i32_0 = arith.constant 0 : i32
    return %c0_i32, %arg1 : i32, i32
  }
  func.func @transform_4(%arg0: i32, %arg1: i32) -> (i32, i32) {
    %c0_i32 = arith.constant 0 : i32
    %c0_i32_0 = arith.constant 0 : i32
    return %c0_i32, %arg1 : i32, i32
  }
  func.func @transform_5(%arg0: i32, %arg1: i32) -> (i32, i32) {
    %c0_i32 = arith.constant 0 : i32
    return %arg0, %arg1 : i32, i32
  }
}

</mosaic_0001>

<bundles_post_ra>
// kernel: prenorm_forward.1
= control target key start
LH: loop header
LB: loop body
LE: loop exit
PB: predicated region body
PF: predicated region fallthrough
CT: control target
= control target key end

     0   :  { %s658_s18 = smov 0   ;;  %s660_s19 = smov 0   ;;  %s731_s0 = inlined_call_operand.vmem [shape: f32[16,128], index: 0, kind: input, shape index: {}]   ;;  %s732_s1 = inlined_call_operand.vmem [shape: f32[1,128], index: 1, kind: input, shape index: {}]   ;;  %s733_s2 = inlined_call_operand.vmem [shape: f32[1,128], index: 2, kind: input, shape index: {}]   ;;  %s734_s3 = inlined_call_operand.vmem [shape: bf16[128,128], index: 3, kind: input, shape index: {}]   ;;  %s735_s4 = inlined_call_operand.vmem [shape: f32[1,128], index: 4, kind: input, shape index: {}]   ;;  %s736_s5 = inlined_call_operand.vmem [shape: f32[16,128], index: 5, kind: output, shape index: {}]  }
   0x1   :  { %s662_s20 = smov 0  }
   0x2 LB: > { %s27_s21 = sadd.s32 1, %s620_s19  ;;  %p521_p0 = scmp.ge.s32.totalorder %s624_s20, 1  ;;  %s624_s20 = sphi %s662_s20, %s15_s20   ;;  %s620_s19 = sphi %s660_s19, %s738_s19   ;;  %s616_s18 = sphi %s658_s18, %s737_s18  }
   0x3   : > { %p29_p1 = scmp.ge.s32.totalorder %s27_s21, 2  ;;  %p217_p2 = scmp.lt.s32.totalorder %s624_s20, 3 }
   0x5   : > { %s740_s21 = smov (%p29_p1, %s27_s21), 0  ;;  %p218_p3 = pnand %p521_p0, %p217_p2 }
   0x6   : > { %p253_p4 = scmp.lt.s32.totalorder (!%p218_p3), %s616_s18, 1 }
   0x7   : > { %221 = sbr.rel (%p218_p3) target bundleno = 387 (0x183), region = 40 }
   0xc   : > { %s742_s18 = smov (!%p253_p4, %s616_s18), 1  ;;  %v592_v2 = vld [vmem:[%s734_s3 + $0x38] sm:$0xff]   ;;  %v626_v3 = vmov 0.0   ;;  %v593_v4 = vld [vmem:[%s734_s3 + $0x30] sm:$0xff]   ;;  %v594_v5 = vld [vmem:[%s734_s3 + $0x28] sm:$0xff]   ;;  %vm627_vm0 = vmmov 0  }
   0xd   : > { %s522_s22 = sshll.u32 %s742_s18, 3  ;;  %546 = vmatprep.subr.bf16.mxu0 %v626_v3  ;;  %v595_v6 = vld [vmem:[%s734_s3 + $0x20] sm:$0xff]   ;;  %562 = vmatprep.mubr.msk.bf16.mxu0 %vm627_vm0, %v626_v3  ;;  %v596_v7 = vld [vmem:[%s734_s3 + $0x18] sm:$0xff]   ;;  %v597_v8 = vld [vmem:[%s734_s3 + $0x10] sm:$0xff]  }
   0xe   : > { %s256_s25 = scalar_lea.vmem %s731_s0, %s522_s22  ;;  %547 = vmatpush3.bf16.msra.mxu0 %v592_v2  ;;  %v598_v9 = vld [vmem:[%s734_s3 + $0x8] sm:$0xff]   ;;  %v599_v10 = vld [vmem:[%s734_s3] sm:$0xff]   ;;  %s270_s30 = scalar_lea.vmem %s736_s5, %s522_s22 }
   0xf   : > { %v272_v0 = vld [vmem:[%s256_s25] sm:$0xff]  ;;  %548 = vmatprep.subr.bf16.mxu0 %v626_v3 }
  0x10   : > { %273 = vadd.xlane.f32.xlu0 %v272_v0  ;;  %v275_v1 = vmul.f32 %v272_v0, %v272_v0  ;;  %v524_v21 = vld [vmem:[%s732_s1] ss:$0 sm:$0xff] }
  0x11   : > { %v525_v23 = vld [vmem:[%s733_s2] ss:$0 sm:$0xff] }
  0x12   : > { %549 = vmatpush3.bf16.msra.mxu0 %v593_v4  ;;  %v526_v27 = vld [vmem:[%s735_s4] ss:$0 sm:$0xff] }
  0x13   : > { %550 = vmatprep.subr.bf16.mxu0 %v626_v3 }
  0x14   : > { %276 = vadd.xlane.f32.xlu0 %v275_v1 }
  0x16   : > { %551 = vmatpush3.bf16.msra.mxu0 %v594_v5 }
  0x17   : > { %552 = vmatprep.subr.bf16.mxu0 %v626_v3 }
  0x1a   : > { %553 = vmatpush3.bf16.msra.mxu0 %v595_v6 }
  0x1b   : > { %554 = vmatprep.subr.bf16.mxu0 %v626_v3 }
  0x1e   : > { %555 = vmatpush3.bf16.msra.mxu0 %v596_v7 }
  0x1f   : > { %556 = vmatprep.subr.bf16.mxu0 %v626_v3 }
  0x22   : > { %557 = vmatpush3.bf16.msra.mxu0 %v597_v8 }
  0x23   : > { %558 = vmatprep.subr.bf16.mxu0 %v626_v3 }
  0x26   : > { %559 = vmatpush3.bf16.msra.mxu0 %v598_v9 }
  0x27   : > { %560 = vmatprep.subr.bf16.mxu0 %v626_v3 }
  0x2a   : > { %561 = vmatpush3.bf16.msra.mxu0 %v599_v10 }
  0x99   : > { %v274_v11 = vpop.xlane.xlu0 %273 }
  0x9a   : > { %v278_v12 = vmul.f32 0.03125, %v274_v11 }
  0x9c   : > { %v280_v14 = vmul.f32 %v278_v12, %v278_v12  ;;  %v285_v19 = vsub.f32 %v272_v0, %v278_v12 }
  0x9d   : > { %v277_v13 = vpop.xlane.xlu0 %276 }
  0x9e   : > { %v279_v15 = vmul.f32 0.03125, %v277_v13 }
  0xa0   : > { %v281_v16 = vsub.f32 %v279_v15, %v280_v14 }
  0xa2   : > { %v282_v17 = vmax.f32 %v281_v16, 0.0 }
  0xa4   : > { %v283_v18 = vadd.f32 1e-05, %v282_v17 }
  0xa6   : > { %600 = vrsqrt.f32 %v283_v18 }
  0xb3   : > { %v601_v20 = vpop.eup %600 }
  0xb4   : > { %v286_v22 = vmul.f32 %v601_v20, %v285_v19 }
  0xb6   : > { %v294_v24 = vmul.f32 %v524_v21, %v286_v22 }
  0xb8   : > { %v302_v25 = vadd.f32 %v525_v23, %v294_v24 }
  0xba   : > { %v303_v26 = vpack.c.bf16 %v302_v25, %v302_v25 }
  0xbc   : > { %563 = vmatmul.mubr.bf16.vlgmr.msra.gmra.mxu0 %v303_v26 }
 0x17c   : > { %v409_v28 = vpop.f32.mrf.mxu0 }
 0x17d   : > { %v410_v29 = vadd.f32 %v526_v27, %v409_v28 }
 0x17e   : > { %v564_v30 = vpop.f32.mrf.mxu0 }
 0x17f   : > { %415 = vst [vmem:[%s270_s30] sm:$0xff] %v410_v29 }
 0x180   : > { %v412_v31 = vpop.f32.mrf.mxu0 }
 0x182   : > { %v565_v32 = vpop.f32.mrf.mxu0 }
 0x183 PF: > { %s15_s20 = sadd.s32 1, %s624_s20   ;;  %s737_s18 = smov %s620_s19 }
 0x184   : > { %p12_p5 = scmp.ge.s32.totalorder %s15_s20, 4   ;;  %s738_s19 = smov %s740_s21 }
 0x186   :  { %14 = sbr.rel (!%p12_p5) target bundleno = 2 (0x2), region = 76 }

</bundles_post_ra>
